<compile_context>
chip_gen: v7x
topology: tpu7x:2x2x1
jax: 0.10.0
libtpu: 0.0.40
codegen_flags: <defaults>
</compile_context>

<pallas_src>
import jax
import jax.numpy as jnp
from jax.experimental import pallas as pl
from jax.experimental.pallas import tpu as pltpu

_LANE = 128
_SUBLANE = 8


def _round_up(x, m):
    return (x + m - 1) // m * m


def _vmem_capacity_bytes():
    """Per-TensorCore VMEM capacity; conservative (v7x, 64 MiB) fallback."""
    try:
        return int(pltpu.get_tpu_info().vmem_capacity_bytes)
    except Exception:
        return 64 << 20


def _autoencoder_kernel(
    x_ref,
    w1_ref, b1_ref,
    w2_ref, b2_ref,
    w3_ref, b3_ref,
    w4_ref, b4_ref,
    w5_ref, b5_ref,
    w6_ref, b6_ref,
    o_ref,
):
    """All six Linear layers + ReLUs fused; one batch tile per grid step."""
    x = x_ref[...].astype(jnp.float32)   # no-op for f32 I/O, upcast for bf16 I/O

    def linear(h, w_ref, b_ref):
        return jnp.dot(h, w_ref[...], preferred_element_type=jnp.float32) + b_ref[...]

    # Encoder: D -> 64 -> 32 -> 16  (ReLU after each)
    h = jnp.maximum(linear(x, w1_ref, b1_ref), 0.0)
    h = jnp.maximum(linear(h, w2_ref, b2_ref), 0.0)
    h = jnp.maximum(linear(h, w3_ref, b3_ref), 0.0)   # latent

    # Decoder: 16 -> 32 -> 64 -> D  (last layer linear)
    h = jnp.maximum(linear(h, w4_ref, b4_ref), 0.0)
    h = jnp.maximum(linear(h, w5_ref, b5_ref), 0.0)
    h = linear(h, w6_ref, b6_ref)

    o_ref[...] = h.astype(o_ref.dtype)


def autoencoder_forward(x, params, *, max_tile_b=8192, bf16_io=False):
    """x: (B, D); params: list of 6 (W (in,out), b (1,out)) pairs (f32).

    bf16_io=True streams x and the output in bf16 (f32 compute inside),
    halving HBM traffic at ~1e-2 relative accuracy.
    """
    B, D = x.shape
    (w1, b1), (w2, b2), (w3, b3), (w4, b4), (w5, b5), (w6, b6) = params
    weight_args = [w1, b1, w2, b2, w3, b3, w4, b4, w5, b5, w6, b6]

    if bf16_io:
        x = x.astype(jnp.bfloat16)
    io_dtype = x.dtype
    io_itemsize = jnp.dtype(io_dtype).itemsize
    # Sublane alignment for the batch-tile rows (8 rows per f32 vreg, 16 for bf16).
    row_align = _SUBLANE * max(1, 4 // io_itemsize)

    # ---- Size the batch tile from a generation-aware VMEM budget -----------
    vmem_cap = _vmem_capacity_bytes()
    budget = min(int(vmem_cap * 0.75), vmem_cap - (16 << 20))   # 48 MiB v7x / 96 MiB v5e,v6e

    # Constant-index weight blocks are still double-buffered by the pipeline.
    weight_bytes = 2 * sum(int(a.size) * a.dtype.itemsize for a in weight_args)
    # Per batch row: double-buffered input + output tiles, plus fused
    # intermediate activations / matmul temporaries (<=208 f32, budget 512).
    per_row = 4 * D * io_itemsize + 512 * 4
    max_rows = max(row_align, (budget - weight_bytes - (4 << 20)) // per_row)

    if B <= row_align:
        tile_b = B                                   # single block == full batch dim
    else:
        tile_b = min(B, max_tile_b, max_rows)
        tile_b = max(row_align, (tile_b // row_align) * row_align)

    grid = (pl.cdiv(B, tile_b),)                     # ragged last tile masked by Pallas

    def io_spec():
        # Full, unpadded D as the last block dim (== array extent), so input
        # streaming / output writeback need no host-side pad or slice pass.
        return pl.BlockSpec((tile_b, D), lambda i: (i, 0))

    def const_spec(arr):
        # Full-array block, constant index -> fetched once, VMEM-resident.
        return pl.BlockSpec(arr.shape, lambda i: (0, 0))

    # VMEM limit: actual estimate with generous margin, clamped well below the
    # physical ceiling (Mosaic needs internal scratch headroom, esp. on v7x),
    # and at least 32 MiB so we never sit below the v5e/v6e scoped defaults.
    io_bytes = 4 * tile_b * D * io_itemsize
    act_bytes = tile_b * 512 * 4
    est = io_bytes + act_bytes + weight_bytes
    ceiling = min(int(vmem_cap * 0.85), vmem_cap - (8 << 20))
    vmem_limit = min(max(2 * est + (8 << 20), 32 << 20), ceiling)

    out = pl.pallas_call(
        _autoencoder_kernel,
        out_shape=jax.ShapeDtypeStruct((B, D), io_dtype),
        grid=grid,
        in_specs=[io_spec()] + [const_spec(a) for a in weight_args],
        out_specs=io_spec(),
        compiler_params=pltpu.CompilerParams(
            # "parallel" lets the runtime shard the batch axis across
            # TensorCores on multi-core parts (v7x); harmless on v5e/v6e.
            dimension_semantics=("parallel",),
            vmem_limit_bytes=int(vmem_limit),
        ),
    )(x, *weight_args)
    return out


def init_params(key, input_dim):
    """PyTorch-style nn.Linear init, stored transposed: W (in,out), b (1,out)."""
    dims = [input_dim, 64, 32, 16, 32, 64, input_dim]
    params = []
    for i in range(len(dims) - 1):
        fan_in, fan_out = dims[i], dims[i + 1]
        key, kw, kb = jax.random.split(key, 3)
        bound = 1.0 / jnp.sqrt(jnp.float32(fan_in))
        w = jax.random.uniform(kw, (fan_in, fan_out), jnp.float32, -bound, bound)
        b = jax.random.uniform(kb, (1, fan_out), jnp.float32, -bound, bound)
        params.append((w, b))
    return params


def reference_forward(x, params):
    h = x
    n = len(params)
    for i, (w, b) in enumerate(params):
        h = h @ w + b
        if i != n - 1:
            h = jnp.maximum(h, 0.0)
    return h


if __name__ == "__main__":
    key = jax.random.PRNGKey(0)

    # Small test consistent with the module (single-tile path, exact D=32).
    batch, input_dim = 8, 32
    kx, kp = jax.random.split(key)
    x = jax.random.normal(kx, (batch, input_dim), jnp.float32)
    params = init_params(kp, input_dim)

    out = jax.block_until_ready(autoencoder_forward(x, params))
    ref = reference_forward(x, params)
    assert out.shape == (batch, input_dim)
    assert jnp.allclose(out, ref, atol=1e-5, rtol=1e-5)

    # Multi-tile path: batch not a multiple of the tile -> ragged last tile,
    # exercised with no host-side padding or slicing.
    kx2 = jax.random.fold_in(kx, 1)
    x2 = jax.random.normal(kx2, (40, input_dim), jnp.float32)
    out2 = jax.block_until_ready(autoencoder_forward(x2, params, max_tile_b=16))
    ref2 = reference_forward(x2, params)
    assert out2.shape == (40, input_dim)
    assert jnp.allclose(out2, ref2, atol=1e-5, rtol=1e-5)

    # Optional bf16-streaming path (halves HBM bytes; f32 compute inside).
    out3 = jax.block_until_ready(
        autoencoder_forward(x2, params, max_tile_b=16, bf16_io=True))
    assert out3.shape == (40, input_dim)
    assert jnp.allclose(out3.astype(jnp.float32), ref2, atol=5e-2, rtol=5e-2)

    print("KERNEL_OK")
</pallas_src>

<mosaic_0001>
module attributes {stable_mosaic.version = 11 : i64} {
  func.func @_autoencoder_kernel(%arg0: i32, %arg1: memref<8x32xf32, #tpu.memory_space<vmem>>, %arg2: memref<32x64xf32, #tpu.memory_space<vmem>>, %arg3: memref<1x64xf32, #tpu.memory_space<vmem>>, %arg4: memref<64x32xf32, #tpu.memory_space<vmem>>, %arg5: memref<1x32xf32, #tpu.memory_space<vmem>>, %arg6: memref<32x16xf32, #tpu.memory_space<vmem>>, %arg7: memref<1x16xf32, #tpu.memory_space<vmem>>, %arg8: memref<16x32xf32, #tpu.memory_space<vmem>>, %arg9: memref<1x32xf32, #tpu.memory_space<vmem>>, %arg10: memref<32x64xf32, #tpu.memory_space<vmem>>, %arg11: memref<1x64xf32, #tpu.memory_space<vmem>>, %arg12: memref<64x32xf32, #tpu.memory_space<vmem>>, %arg13: memref<1x32xf32, #tpu.memory_space<vmem>>, %arg14: memref<8x32xf32, #tpu.memory_space<vmem>>) attributes {dimension_semantics = [#tpu.dimension_semantics<parallel>], iteration_bounds = array<i64: 1>, scalar_prefetch = 0 : i64, scratch_operands = 0 : i64, tpu.core_type = #tpu.core_type<tc>, window_params = [{transform_indices = @transform_0, window_bounds = array<i64: 8, 32>}, {pipeline_mode = #tpu.pipeline_mode<synchronous>, transform_indices = @transform_1, window_bounds = array<i64: 32, 64>}, {pipeline_mode = #tpu.pipeline_mode<synchronous>, transform_indices = @transform_2, window_bounds = array<i64: 1, 64>}, {pipeline_mode = #tpu.pipeline_mode<synchronous>, transform_indices = @transform_3, window_bounds = array<i64: 64, 32>}, {pipeline_mode = #tpu.pipeline_mode<synchronous>, transform_indices = @transform_4, window_bounds = array<i64: 1, 32>}, {pipeline_mode = #tpu.pipeline_mode<synchronous>, transform_indices = @transform_5, window_bounds = array<i64: 32, 16>}, {pipeline_mode = #tpu.pipeline_mode<synchronous>, transform_indices = @transform_6, window_bounds = array<i64: 1, 16>}, {pipeline_mode = #tpu.pipeline_mode<synchronous>, transform_indices = @transform_7, window_bounds = array<i64: 16, 32>}, {pipeline_mode = #tpu.pipeline_mode<synchronous>, transform_indices = @transform_8, window_bounds = array<i64: 1, 32>}, {pipeline_mode = #tpu.pipeline_mode<synchronous>, transform_indices = @transform_9, window_bounds = array<i64: 32, 64>}, {pipeline_mode = #tpu.pipeline_mode<synchronous>, transform_indices = @transform_10, window_bounds = array<i64: 1, 64>}, {pipeline_mode = #tpu.pipeline_mode<synchronous>, transform_indices = @transform_11, window_bounds = array<i64: 64, 32>}, {pipeline_mode = #tpu.pipeline_mode<synchronous>, transform_indices = @transform_12, window_bounds = array<i64: 1, 32>}, {transform_indices = @transform_13, window_bounds = array<i64: 8, 32>}]} {
    %c0 = arith.constant 0 : index
    %c0_0 = arith.constant 0 : index
    %0 = vector.load %arg1[%c0, %c0_0] : memref<8x32xf32, #tpu.memory_space<vmem>>, vector<8x32xf32>
    %c0_1 = arith.constant 0 : index
    %c0_2 = arith.constant 0 : index
    %1 = vector.load %arg2[%c0_1, %c0_2] : memref<32x64xf32, #tpu.memory_space<vmem>>, vector<32x64xf32>
    %cst = arith.constant dense<0.000000e+00> : vector<8x64xf32>
    %2 = tpu.matmul %0, %1, %cst {dimension_numbers = #tpu.dot_dimension_numbers<[1], [0], [0], [1], [0, 0, 1, 1], [], []>} : vector<8x32xf32>, vector<32x64xf32>, vector<8x64xf32> -> vector<8x64xf32>
    %c0_3 = arith.constant 0 : index
    %c0_4 = arith.constant 0 : index
    %3 = vector.load %arg3[%c0_3, %c0_4] : memref<1x64xf32, #tpu.memory_space<vmem>>, vector<1x64xf32>
    %4 = vector.broadcast %3 : vector<1x64xf32> to vector<8x64xf32>
    %5 = arith.addf %2, %4 : vector<8x64xf32>
    %cst_5 = arith.constant 0.000000e+00 : f32
    %6 = vector.broadcast %cst_5 : f32 to vector<8x64xf32>
    %7 = arith.maximumf %5, %6 : vector<8x64xf32>
    %c0_6 = arith.constant 0 : index
    %c0_7 = arith.constant 0 : index
    %8 = vector.load %arg4[%c0_6, %c0_7] : memref<64x32xf32, #tpu.memory_space<vmem>>, vector<64x32xf32>
    %cst_8 = arith.constant dense<0.000000e+00> : vector<8x32xf32>
    %9 = tpu.matmul %7, %8, %cst_8 {dimension_numbers = #tpu.dot_dimension_numbers<[1], [0], [0], [1], [0, 0, 1, 1], [], []>} : vector<8x64xf32>, vector<64x32xf32>, vector<8x32xf32> -> vector<8x32xf32>
    %c0_9 = arith.constant 0 : index
    %c0_10 = arith.constant 0 : index
    %10 = vector.load %arg5[%c0_9, %c0_10] : memref<1x32xf32, #tpu.memory_space<vmem>>, vector<1x32xf32>
    %11 = vector.broadcast %10 : vector<1x32xf32> to vector<8x32xf32>
    %12 = arith.addf %9, %11 : vector<8x32xf32>
    %cst_11 = arith.constant 0.000000e+00 : f32
    %13 = vector.broadcast %cst_11 : f32 to vector<8x32xf32>
    %14 = arith.maximumf %12, %13 : vector<8x32xf32>
    %c0_12 = arith.constant 0 : index
    %c0_13 = arith.constant 0 : index
    %15 = vector.load %arg6[%c0_12, %c0_13] : memref<32x16xf32, #tpu.memory_space<vmem>>, vector<32x16xf32>
    %cst_14 = arith.constant dense<0.000000e+00> : vector<8x16xf32>
    %16 = tpu.matmul %14, %15, %cst_14 {dimension_numbers = #tpu.dot_dimension_numbers<[1], [0], [0], [1], [0, 0, 1, 1], [], []>} : vector<8x32xf32>, vector<32x16xf32>, vector<8x16xf32> -> vector<8x16xf32>
    %c0_15 = arith.constant 0 : index
    %c0_16 = arith.constant 0 : index
    %17 = vector.load %arg7[%c0_15, %c0_16] : memref<1x16xf32, #tpu.memory_space<vmem>>, vector<1x16xf32>
    %18 = vector.broadcast %17 : vector<1x16xf32> to vector<8x16xf32>
    %19 = arith.addf %16, %18 : vector<8x16xf32>
    %cst_17 = arith.constant 0.000000e+00 : f32
    %20 = vector.broadcast %cst_17 : f32 to vector<8x16xf32>
    %21 = arith.maximumf %19, %20 : vector<8x16xf32>
    %c0_18 = arith.constant 0 : index
    %c0_19 = arith.constant 0 : index
    %22 = vector.load %arg8[%c0_18, %c0_19] : memref<16x32xf32, #tpu.memory_space<vmem>>, vector<16x32xf32>
    %cst_20 = arith.constant dense<0.000000e+00> : vector<8x32xf32>
    %23 = tpu.matmul %21, %22, %cst_20 {dimension_numbers = #tpu.dot_dimension_numbers<[1], [0], [0], [1], [0, 0, 1, 1], [], []>} : vector<8x16xf32>, vector<16x32xf32>, vector<8x32xf32> -> vector<8x32xf32>
    %c0_21 = arith.constant 0 : index
    %c0_22 = arith.constant 0 : index
    %24 = vector.load %arg9[%c0_21, %c0_22] : memref<1x32xf32, #tpu.memory_space<vmem>>, vector<1x32xf32>
    %25 = vector.broadcast %24 : vector<1x32xf32> to vector<8x32xf32>
    %26 = arith.addf %23, %25 : vector<8x32xf32>
    %cst_23 = arith.constant 0.000000e+00 : f32
    %27 = vector.broadcast %cst_23 : f32 to vector<8x32xf32>
    %28 = arith.maximumf %26, %27 : vector<8x32xf32>
    %c0_24 = arith.constant 0 : index
    %c0_25 = arith.constant 0 : index
    %29 = vector.load %arg10[%c0_24, %c0_25] : memref<32x64xf32, #tpu.memory_space<vmem>>, vector<32x64xf32>
    %cst_26 = arith.constant dense<0.000000e+00> : vector<8x64xf32>
    %30 = tpu.matmul %28, %29, %cst_26 {dimension_numbers = #tpu.dot_dimension_numbers<[1], [0], [0], [1], [0, 0, 1, 1], [], []>} : vector<8x32xf32>, vector<32x64xf32>, vector<8x64xf32> -> vector<8x64xf32>
    %c0_27 = arith.constant 0 : index
    %c0_28 = arith.constant 0 : index
    %31 = vector.load %arg11[%c0_27, %c0_28] : memref<1x64xf32, #tpu.memory_space<vmem>>, vector<1x64xf32>
    %32 = vector.broadcast %31 : vector<1x64xf32> to vector<8x64xf32>
    %33 = arith.addf %30, %32 : vector<8x64xf32>
    %cst_29 = arith.constant 0.000000e+00 : f32
    %34 = vector.broadcast %cst_29 : f32 to vector<8x64xf32>
    %35 = arith.maximumf %33, %34 : vector<8x64xf32>
    %c0_30 = arith.constant 0 : index
    %c0_31 = arith.constant 0 : index
    %36 = vector.load %arg12[%c0_30, %c0_31] : memref<64x32xf32, #tpu.memory_space<vmem>>, vector<64x32xf32>
    %cst_32 = arith.constant dense<0.000000e+00> : vector<8x32xf32>
    %37 = tpu.matmul %35, %36, %cst_32 {dimension_numbers = #tpu.dot_dimension_numbers<[1], [0], [0], [1], [0, 0, 1, 1], [], []>} : vector<8x64xf32>, vector<64x32xf32>, vector<8x32xf32> -> vector<8x32xf32>
    %c0_33 = arith.constant 0 : index
    %c0_34 = arith.constant 0 : index
    %38 = vector.load %arg13[%c0_33, %c0_34] : memref<1x32xf32, #tpu.memory_space<vmem>>, vector<1x32xf32>
    %39 = vector.broadcast %38 : vector<1x32xf32> to vector<8x32xf32>
    %40 = arith.addf %37, %39 : vector<8x32xf32>
    %c0_35 = arith.constant 0 : index
    %c0_36 = arith.constant 0 : index
    %41 = vector.load %arg14[%c0_35, %c0_36] : memref<8x32xf32, #tpu.memory_space<vmem>>, vector<8x32xf32>
    tpu.vector_store %arg14[%c0_35, %c0_36], %40 {strides = array<i32>} : memref<8x32xf32, #tpu.memory_space<vmem>>, vector<8x32xf32>,
    return
  }
  func.func @transform_0(%arg0: i32) -> (i32, i32) {
    %c0_i32 = arith.constant 0 : i32
    %c0_i32_0 = arith.constant 0 : i32
    return %arg0, %c0_i32 : i32, i32
  }
  func.func @transform_1(%arg0: i32) -> (i32, i32) {
    %c0_i32 = arith.constant 0 : i32
    %c0_i32_0 = arith.constant 0 : i32
    %c0_i32_1 = arith.constant 0 : i32
    return %c0_i32, %c0_i32_0 : i32, i32
  }
  func.func @transform_2(%arg0: i32) -> (i32, i32) {
    %c0_i32 = arith.constant 0 : i32
    %c0_i32_0 = arith.constant 0 : i32
    %c0_i32_1 = arith.constant 0 : i32
    return %c0_i32, %c0_i32_0 : i32, i32
  }
  func.func @transform_3(%arg0: i32) -> (i32, i32) {
    %c0_i32 = arith.constant 0 : i32
    %c0_i32_0 = arith.constant 0 : i32
    %c0_i32_1 = arith.constant 0 : i32
    return %c0_i32, %c0_i32_0 : i32, i32
  }
  func.func @transform_4(%arg0: i32) -> (i32, i32) {
    %c0_i32 = arith.constant 0 : i32
    %c0_i32_0 = arith.constant 0 : i32
    %c0_i32_1 = arith.constant 0 : i32
    return %c0_i32, %c0_i32_0 : i32, i32
  }
  func.func @transform_5(%arg0: i32) -> (i32, i32) {
    %c0_i32 = arith.constant 0 : i32
    %c0_i32_0 = arith.constant 0 : i32
    %c0_i32_1 = arith.constant 0 : i32
    return %c0_i32, %c0_i32_0 : i32, i32
  }
  func.func @transform_6(%arg0: i32) -> (i32, i32) {
    %c0_i32 = arith.constant 0 : i32
    %c0_i32_0 = arith.constant 0 : i32
    %c0_i32_1 = arith.constant 0 : i32
    return %c0_i32, %c0_i32_0 : i32, i32
  }
  func.func @transform_7(%arg0: i32) -> (i32, i32) {
    %c0_i32 = arith.constant 0 : i32
    %c0_i32_0 = arith.constant 0 : i32
    %c0_i32_1 = arith.constant 0 : i32
    return %c0_i32, %c0_i32_0 : i32, i32
  }
  func.func @transform_8(%arg0: i32) -> (i32, i32) {
    %c0_i32 = arith.constant 0 : i32
    %c0_i32_0 = arith.constant 0 : i32
    %c0_i32_1 = arith.constant 0 : i32
    return %c0_i32, %c0_i32_0 : i32, i32
  }
  func.func @transform_9(%arg0: i32) -> (i32, i32) {
    %c0_i32 = arith.constant 0 : i32
    %c0_i32_0 = arith.constant 0 : i32
    %c0_i32_1 = arith.constant 0 : i32
    return %c0_i32, %c0_i32_0 : i32, i32
  }
  func.func @transform_10(%arg0: i32) -> (i32, i32) {
    %c0_i32 = arith.constant 0 : i32
    %c0_i32_0 = arith.constant 0 : i32
    %c0_i32_1 = arith.constant 0 : i32
    return %c0_i32, %c0_i32_0 : i32, i32
  }
  func.func @transform_11(%arg0: i32) -> (i32, i32) {
    %c0_i32 = arith.constant 0 : i32
    %c0_i32_0 = arith.constant 0 : i32
    %c0_i32_1 = arith.constant 0 : i32
    return %c0_i32, %c0_i32_0 : i32, i32
  }
  func.func @transform_12(%arg0: i32) -> (i32, i32) {
    %c0_i32 = arith.constant 0 : i32
    %c0_i32_0 = arith.constant 0 : i32
    %c0_i32_1 = arith.constant 0 : i32
    return %c0_i32, %c0_i32_0 : i32, i32
  }
  func.func @transform_13(%arg0: i32) -> (i32, i32) {
    %c0_i32 = arith.constant 0 : i32
    %c0_i32_0 = arith.constant 0 : i32
    return %arg0, %c0_i32 : i32, i32
  }
}

</mosaic_0001>

<bundles_post_ra>
// kernel: tpu_custom_call.1
= control target key start
LH: loop header
LB: loop body
LE: loop exit
PB: predicated region body
PF: predicated region fallthrough
CT: control target
= control target key end

     0   :  { %v778_v3 = vmov 0.0|0.0   ;;  %vm779_vm0 = vmmov 0   ;;  %v780_v6 = vmov 0.0   ;;  %s1008_s0 = inlined_call_operand.vmem [shape: f32[8,32], index: 0, kind: input, shape index: {}]   ;;  %s1009_s1 = inlined_call_operand.vmem [shape: f32[32,64], index: 1, kind: input, shape index: {}]   ;;  %s1010_s2 = inlined_call_operand.vmem [shape: f32[1,64], index: 2, kind: input, shape index: {}]   ;;  %s1011_s3 = inlined_call_operand.vmem [shape: f32[64,32], index: 3, kind: input, shape index: {}]   ;;  %s1012_s4 = inlined_call_operand.vmem [shape: f32[1,32], index: 4, kind: input, shape index: {}]   ;;  %s1013_s5 = inlined_call_operand.vmem [shape: f32[32,16], index: 5, kind: input, shape index: {}]   ;;  %s1014_s6 = inlined_call_operand.vmem [shape: f32[1,16], index: 6, kind: input, shape index: {}]   ;;  %s1015_s7 = inlined_call_operand.vmem [shape: f32[16,32], index: 7, kind: input, shape index: {}]   ;;  %s1016_s8 = inlined_call_operand.vmem [shape: f32[1,32], index: 8, kind: input, shape index: {}]   ;;  %s1017_s9 = inlined_call_operand.vmem [shape: f32[32,64], index: 9, kind: input, shape index: {}]   ;;  %s1018_s10 = inlined_call_operand.vmem [shape: f32[1,64], index: 10, kind: input, shape index: {}]   ;;  %s1019_s11 = inlined_call_operand.vmem [shape: f32[64,32], index: 11, kind: input, shape index: {}]   ;;  %s1020_s12 = inlined_call_operand.vmem [shape: f32[1,32], index: 12, kind: input, shape index: {}]   ;;  %s1021_s13 = inlined_call_operand.hbm [shape: f32[8,32], index: 13, kind: output, shape index: {}]  }
   0x1   :  { %v46_v0 = vld [vmem:[%s1009_s1] sm:$0xff]  ;;  %v47_v1 = vld [vmem:[%s1009_s1 + $0x8] sm:$0xff]  ;;  %v48_v2 = vld [vmem:[%s1009_s1 + $0x10] sm:$0xff]  ;;  %705 = vmatprep.subr.bf16.mxu1 %v778_v3  ;;  %635 = vmatprep.mubr.msk.f32.mxu1 %vm779_vm0, %v780_v6 }
   0x2   :  { %v706_v4 = vpack.c.bf16 %v47_v1, %v46_v0  ;;  %v49_v5 = vld [vmem:[%s1009_s1 + $0x18] sm:$0xff]  ;;  %723 = vmatprep.subr.bf16.mxu0 %v778_v3  ;;  %665 = vmatprep.mubr.msk.f32.mxu0 %vm779_vm0, %v780_v6  ;;  %v132_v8 = vld [vmem:[%s1011_s3] sm:$0xff]  ;;  %v133_v9 = vld [vmem:[%s1011_s3 + $0x8] sm:$0xff] }
   0x3   :  { %v709_v7 = vpack.c.bf16 %v49_v5, %v48_v2 }
   0x4   :  { %707 = vmatpush3.bf16.msra.mxu1 %v706_v4 }
   0x5   :  { %708 = vmatprep.subr.bf16.mxu1 %v778_v3 }
   0x6   :  { %18 = vsyncpa [#allocation3], 0  ;;  %v45_v10 = vld [vmem:[%s1008_s0] sm:$0xff]  ;;  %vm57_vm1 = vcmask 261120   ;;  %v712_v11 = vpack.c.bf16 %v133_v9, %v132_v8  ;;  %v134_v12 = vld [vmem:[%s1011_s3 + $0x10] sm:$0xff]  ;;  %vm147_vm2 = vcmask 523264  }
   0x7   :  { %v135_v13 = vld [vmem:[%s1011_s3 + $0x18] sm:$0xff]  ;;  %v136_v15 = vld [vmem:[%s1011_s3 + $0x20] sm:$0xff]  ;;  %v137_v16 = vld [vmem:[%s1011_s3 + $0x28] sm:$0xff]  ;;  %vm316_vm3 = vcmask 130048   ;;  %s781_s30 = smov [#allocation2]  }
   0x8   :  { %710 = vmatpush3.bf16.msra.mxu1 %v709_v7  ;;  %v715_v14 = vpack.c.bf16 %v135_v13, %v134_v12  ;;  %v718_v17 = vpack.c.bf16 %v137_v16, %v136_v15  ;;  %v138_v18 = vld [vmem:[%s1011_s3 + $0x30] sm:$0xff]  ;;  %v139_v19 = vld [vmem:[%s1011_s3 + $0x38] sm:$0xff]  ;;  %v222_v21 = vld [vmem:[%s1013_s5] sm:$0xff] }
   0x9   :  { %711 = vmatprep.subr.bf16.mxu1 %v778_v3  ;;  %v721_v20 = vpack.c.bf16 %v139_v19, %v138_v18  ;;  %v223_v22 = vld [vmem:[%s1013_s5 + $0x8] sm:$0xff]  ;;  %v579_v24 = vld [vmem:[%s1010_s2] ss:$0 sm:$0xff]  ;;  %v224_v29 = vld [vmem:[%s1013_s5 + $0x10] sm:$0xff] }
   0xa   :  { %v724_v23 = vpack.c.bf16 %v223_v22, %v222_v21  ;;  %v225_v30 = vld [vmem:[%s1013_s5 + $0x18] sm:$0xff]  ;;  %v581_v32 = vld [vmem:[%s1012_s4] ss:$0 sm:$0xff]  ;;  %v308_v38 = vld [vmem:[%s1015_s7 + $0x8] sm:$0xff] }
   0xb   :  { %636 = vmatmul.mubr.msk.f32.vlgmr.msra.gmra.mrb[0].mxu1 %vm57_vm1, %v45_v10  ;;  %v727_v31 = vpack.c.bf16 %v225_v30, %v224_v29  ;;  %v307_v37 = vld [vmem:[%s1015_s7] sm:$0xff]  ;;  %v392_v41 = vld [vmem:[%s1017_s9 + $0x8] sm:$0xff]  ;;  %v393_v48 = vld [vmem:[%s1017_s9 + $0x10] sm:$0xff]  ;;  %s571_s7 = sshll.u32 %s781_s30, 4  ;;  %s572_s7 = int_to_ptr.vmem [resolvable:$true] %s571_s7 }
   0xc   :  { %713 = vmatpush3.bf16.msra.mxu1 %v712_v11  ;;  %654 = vmatprep.mubr.msk.f32.mxu1 %vm779_vm0, %v780_v6  ;;  %v730_v39 = vpack.c.bf16 %v308_v38, %v307_v37  ;;  %v391_v40 = vld [vmem:[%s1017_s9] sm:$0xff]  ;;  %v394_v49 = vld [vmem:[%s1017_s9 + $0x18] sm:$0xff]  ;;  %v477_v52 = vld [vmem:[%s1019_s11 + $0x8] sm:$0xff]  ;;  %p759_p1 = scmp.lt.s32.totalorder %s572_s7, %s572_s7 }
   0xd   :  { %714 = vmatprep.subr.bf16.mxu1 %v778_v3  ;;  %725 = vmatpush3.bf16.msra.mxu0 %v724_v23  ;;  %v733_v42 = vpack.c.bf16 %v392_v41, %v391_v40  ;;  %v583_v43 = vld [vmem:[%s1014_s6] ss:$0 sm:$0xff]  ;;  %v736_v50 = vpack.c.bf16 %v394_v49, %v393_v48  ;;  %v478_v53 = vld [vmem:[%s1019_s11 + $0x10] sm:$0xff]  ;;  %v479_v55 = vld [vmem:[%s1019_s11 + $0x18] sm:$0xff] }
   0xe   :  { %726 = vmatprep.subr.bf16.mxu0 %v778_v3  ;;  %v476_v51 = vld [vmem:[%s1019_s11] sm:$0xff]  ;;  %v742_v56 = vpack.c.bf16 %v479_v55, %v478_v53  ;;  %v481_v58 = vld [vmem:[%s1019_s11 + $0x28] sm:$0xff]  ;;  %v482_v1 = vld [vmem:[%s1019_s11 + $0x30] sm:$0xff] }
   0xf   :  { %v739_v54 = vpack.c.bf16 %v477_v52, %v476_v51  ;;  %v480_v57 = vld [vmem:[%s1019_s11 + $0x20] sm:$0xff]  ;;  %v483_v2 = vld [vmem:[%s1019_s11 + $0x38] sm:$0xff]  ;;  %s754_s11 = scalar_lea.vmem %s572_s7, 128 }
  0x10   :  { %716 = vmatpush3.bf16.msra.mxu1 %v715_v14  ;;  %v745_v59 = vpack.c.bf16 %v481_v58, %v480_v57  ;;  %v585_v60 = vld [vmem:[%s1016_s8] ss:$0 sm:$0xff]  ;;  %v748_v4 = vpack.c.bf16 %v483_v2, %v482_v1  ;;  %p755_p0 = scmp.ne.s32.totalorder %s572_s7, %s754_s11  ;;  %p760_p2 = scmp.lt.s32.totalorder %s754_s11, %s754_s11 }
  0x11   :  { %717 = vmatprep.subr.bf16.mxu1 %v778_v3  ;;  %728 = vmatpush3.bf16.msra.mxu0 %v727_v31  ;;  %v589_v9 = vld [vmem:[%s1020_s12] ss:$0 sm:$0xff] }
  0x12   :  { %729 = vmatprep.subr.bf16.mxu0 %v778_v3  ;;  %p761_p3 = por %p760_p2, %p759_p1 }
  0x14   :  { %719 = vmatpush3.bf16.msra.mxu1 %v718_v17  ;;  %p762_p4 = pnand %p761_p3, %p755_p0 }
  0x15   :  { %720 = vmatprep.subr.bf16.mxu1 %v778_v3 }
  0x18   :  { %722 = vmatpush3.bf16.msra.mxu1 %v721_v20 }
  0x19   :  { %732 = vmatprep.subr.bf16.mxu1 %v778_v3 }
  0xde   :  { %v127_v25 = vpop.f32.mrb[0].mxu1 }
  0xdf   :  { %v128_v26 = vadd.f32 %v579_v24, %v127_v25  ;;  %v637_v27 = vpop.f32.mrb[1].mxu1 }
  0xe1   :  { %v131_v28 = vmax.f32 %v128_v26, 0.0 }
  0xe3   :  { %655 = vmatmul.mubr.msk.f32.vlgmr.msra.gmra.mrb[2].mxu1 %vm147_vm2, %v131_v28 }
  0xe4   :  { %683 = vmatprep.mubr.msk.f32.mxu1 %vm779_vm0, %v780_v6  ;;  %734 = vmatpush3.bf16.msra.mxu1 %v733_v42 }
  0xe5   :  { %735 = vmatprep.subr.bf16.mxu1 %v778_v3 }
  0xe8   :  { %737 = vmatpush3.bf16.msra.mxu1 %v736_v50 }
 0x1b6   :  { %v217_v33 = vpop.f32.mrb[2].mxu1 }
 0x1b7   :  { %v218_v34 = vadd.f32 %v581_v32, %v217_v33  ;;  %v656_v35 = vpop.f32.mrb[3].mxu1 }
 0x1b9   :  { %v221_v36 = vmax.f32 %v218_v34, 0.0 }
 0x1bb   :  { %666 = vmatmul.mubr.msk.f32.vlgmr.msra.gmra.mrb[0].mxu0 %vm57_vm1, %v221_v36 }
 0x1bc   :  { %672 = vmatprep.mubr.msk.f32.mxu0 %vm779_vm0, %v780_v6  ;;  %731 = vmatpush3.bf16.msra.mxu0 %v730_v39 }
 0x1bd   :  { %738 = vmatprep.subr.bf16.mxu0 %v778_v3 }
 0x28e   :  { %v302_v44 = vpop.f32.mrb[0].mxu0 }
 0x28f   :  { %v303_v45 = vadd.f32 %v583_v43, %v302_v44  ;;  %v667_v46 = vpop.f32.mrb[1].mxu0 }
 0x291   :  { %v306_v47 = vmax.f32 %v303_v45, 0.0 }
 0x293   :  { %673 = vmatmul.mubr.msk.f32.vlgmr.msra.gmra.mrb[2].mxu0 %vm316_vm3, %v306_v47 }
 0x294   :  { %702 = vmatprep.mubr.msk.f32.mxu0 %vm779_vm0, %v780_v6  ;;  %740 = vmatpush3.bf16.msra.mxu0 %v739_v54 }
 0x295   :  { %741 = vmatprep.subr.bf16.mxu0 %v778_v3 }
 0x298   :  { %743 = vmatpush3.bf16.msra.mxu0 %v742_v56 }
 0x299   :  { %744 = vmatprep.subr.bf16.mxu0 %v778_v3 }
 0x29c   :  { %746 = vmatpush3.bf16.msra.mxu0 %v745_v59 }
 0x29d   :  { %747 = vmatprep.subr.bf16.mxu0 %v778_v3  ;;  %v587_v3 = vld [vmem:[%s1018_s10] ss:$0 sm:$0xff] }
 0x2a0   :  { %749 = vmatpush3.bf16.msra.mxu0 %v748_v4 }
 0x366   :  { %v386_v61 = vpop.f32.mrb[2].mxu0 }
 0x367   :  { %v387_v62 = vadd.f32 %v585_v60, %v386_v61  ;;  %v674_v63 = vpop.f32.mrb[3].mxu0 }
 0x369   :  { %v390_v0 = vmax.f32 %v387_v62, 0.0 }
 0x36b   :  { %684 = vmatmul.mubr.msk.f32.vlgmr.msra.gmra.mrb[4].mxu1 %vm57_vm1, %v390_v0 }
 0x43e   :  { %v471_v5 = vpop.f32.mrb[4].mxu1 }
 0x43f   :  { %v472_v6 = vadd.f32 %v587_v3, %v471_v5  ;;  %v685_v7 = vpop.f32.mrb[5].mxu1 }
 0x441   :  { %v475_v8 = vmax.f32 %v472_v6, 0.0 }
 0x443   :  { %703 = vmatmul.mubr.msk.f32.vlgmr.msra.gmra.mrb[4].mxu0 %vm147_vm2, %v475_v8 }
 0x516   :  { %v560_v10 = vpop.f32.mrb[4].mxu0 }
 0x517   :  { %v561_v11 = vadd.f32 %v589_v9, %v560_v10  ;;  %v704_v12 = vpop.f32.mrb[5].mxu0 }
 0x519   :  { %564 = vst.msk [vmem:[#allocation2] sm:$0xff] %vm57_vm1, %v561_v11 }
 0x51a   :  { %765 = shalt.err (!%p762_p4)
}
 0x51b   :  { %s766_s15 = scalar_lea.hbm %s1021_s13, 128 }
 0x51c   :  { %p767_p5 = scmp.ne.s32.totalorder %s1021_s13, %s766_s15  ;;  %p770_p6 = scmp.lt.u32.totalorder %s766_s15, %s1021_s13 }
 0x51e   :  { %p772_p7 = pnand %p770_p6, %p767_p5 }
 0x520   :  { %775 = shalt.err (!%p772_p7)
}
 0x521   :  { %574 = dma.vmem_to_hbm [thread:$0]  %s572_s7, 128, %s1021_s13, [#allocation3]  }
 0x522   :  { %776 = dma.done.wait [#allocation3], 128  }
 0x523   :  { %777 = vsyncadd [#allocation3], 4294967168 }
 0x524   :  { %578 = vsyncpa [#allocation3], 1 }

</bundles_post_ra>
